<compile_context>
chip_gen: v6e
topology: v6e:2x2x1
jax: 0.10.0
libtpu: 0.0.40
codegen_flags: <defaults>
</compile_context>

<pallas_src>
import functools

import jax
import jax.numpy as jnp
from jax.experimental import pallas as pl
from jax.experimental.pallas import tpu as pltpu


N_IN = 64          # 8 * 8
N_H1 = 64
N_H2 = 256
N_OUT = 10
N_OUT_PAD = 128    # lane-dense padded output width


def mlp_kernel(x_ref, w1_ref, b1_ref, w2_ref, b2_ref, w3_ref, b3_ref, o_ref):
    # x tile: (TB, 64)
    x = x_ref[...]

    # fc1 + ReLU : (TB, 64) @ (64, 64) -> (TB, 64)
    h1 = jnp.dot(x, w1_ref[...], preferred_element_type=jnp.float32) + b1_ref[...]
    h1 = jnp.maximum(h1, 0.0)

    # fc2 + ReLU : (TB, 64) @ (64, 256) -> (TB, 256)
    h2 = jnp.dot(h1, w2_ref[...], preferred_element_type=jnp.float32) + b2_ref[...]
    h2 = jnp.maximum(h2, 0.0)

    # fc3 (lane-padded) : (TB, 256) @ (256, 128) -> (TB, 128), unmasked store.
    o_ref[...] = (
        jnp.dot(h2, w3_ref[...], preferred_element_type=jnp.float32) + b3_ref[...]
    )


@functools.partial(jax.jit, static_argnames=("block_b",))
def _mlp_forward_impl(x_flat, w1, b1, w2, b2, w3, b3, *, block_b):
    B = x_flat.shape[0]

    # Zero-pad fc3 to a full 128-lane output so the kernel's store is unmasked.
    w3p = jnp.zeros((N_H2, N_OUT_PAD), w3.dtype).at[:, : w3.shape[1]].set(w3)
    b3p = jnp.zeros((1, N_OUT_PAD), b3.dtype).at[:, : b3.shape[1]].set(b3)

    # Batch tile: multiple of 8 rows (f32 sublane granule), capped at block_b.
    tb = min(block_b, max(8, ((B + 7) // 8) * 8))
    tb = ((tb + 7) // 8) * 8
    n_blocks = pl.cdiv(B, tb)
    b_pad = n_blocks * tb
    if b_pad != B:
        x_flat = jnp.pad(x_flat, ((0, b_pad - B), (0, 0)))

    # Advisory cost estimate (padded shapes).
    flops = 2 * b_pad * (N_IN * N_H1 + N_H1 * N_H2 + N_H2 * N_OUT_PAD)
    param_bytes = 4 * (
        N_IN * N_H1 + N_H1
        + N_H1 * N_H2 + N_H2
        + N_H2 * N_OUT_PAD + N_OUT_PAD
    )
    bytes_accessed = 4 * b_pad * N_IN + param_bytes + 4 * b_pad * N_OUT_PAD
    cost = pl.CostEstimate(
        flops=flops, transcendentals=0, bytes_accessed=bytes_accessed
    )

    def resident(shape):
        return pl.BlockSpec(shape, lambda i: (0, 0))

    out_padded = pl.pallas_call(
        mlp_kernel,
        out_shape=jax.ShapeDtypeStruct((b_pad, N_OUT_PAD), jnp.float32),
        grid=(n_blocks,),
        in_specs=[
            pl.BlockSpec((tb, N_IN), lambda i: (i, 0)),   # x tile (pipelined)
            resident((N_IN, N_H1)),                        # w1 (VMEM-resident)
            resident((1, N_H1)),                           # b1
            resident((N_H1, N_H2)),                        # w2
            resident((1, N_H2)),                           # b2
            resident((N_H2, N_OUT_PAD)),                   # w3 (lane-padded)
            resident((1, N_OUT_PAD)),                      # b3 (lane-padded)
        ],
        out_specs=pl.BlockSpec((tb, N_OUT_PAD), lambda i: (i, 0)),
        compiler_params=pltpu.CompilerParams(
            dimension_semantics=("parallel",),
        ),
        cost_estimate=cost,
    )(x_flat, w1, b1, w2, b2, w3p, b3p)

    # Drop batch padding and the lane padding on the logits.
    return out_padded[:B, :N_OUT]


def mlp_forward(x, params, *, block_b=512):
    """x: (B, 8, 8) float32 -> logits (B, 10) float32."""
    w1, b1, w2, b2, w3, b3 = params
    B = x.shape[0]
    x_flat = x.reshape(B, N_IN)  # torch.flatten(x, 1, -1)
    return _mlp_forward_impl(x_flat, w1, b1, w2, b2, w3, b3, block_b=block_b)


def init_params(key):
    """Deterministic parameter init (same shapes as the PyTorch module).

    Weights are (in_features, out_features); biases are (1, out_features)
    so they broadcast over the batch dimension inside the kernel.
    """
    k1, k2, k3, k4, k5, k6 = jax.random.split(key, 6)

    def lin(kw, kb, fan_in, fan_out):
        bound = 1.0 / jnp.sqrt(fan_in)
        w = jax.random.uniform(kw, (fan_in, fan_out), jnp.float32, -bound, bound)
        b = jax.random.uniform(kb, (1, fan_out), jnp.float32, -bound, bound)
        return w, b

    w1, b1 = lin(k1, k2, N_IN, N_H1)
    w2, b2 = lin(k3, k4, N_H1, N_H2)
    w3, b3 = lin(k5, k6, N_H2, N_OUT)
    return (w1, b1, w2, b2, w3, b3)


def mlp_reference(x, params):
    """Plain-JAX reference for correctness checking."""
    w1, b1, w2, b2, w3, b3 = params
    h = x.reshape(x.shape[0], -1)
    h = jnp.maximum(h @ w1 + b1, 0.0)
    h = jnp.maximum(h @ w2 + b2, 0.0)
    return h @ w3 + b3


if __name__ == "__main__":
    key = jax.random.PRNGKey(0)
    kx, kx2, kp = jax.random.split(key, 3)
    params = init_params(kp)

    # Case 1: batch that exercises a multi-step grid (3 tiles of 8 rows).
    batch = 24
    x = jax.random.normal(kx, (batch, 8, 8), dtype=jnp.float32)
    out = jax.block_until_ready(mlp_forward(x, params, block_b=8))
    ref = mlp_reference(x, params)
    assert out.shape == (batch, N_OUT)
    assert jnp.allclose(out, ref, atol=1e-4, rtol=1e-4)

    # Case 2: ragged batch (padded up to a multiple of 8 inside the wrapper).
    batch2 = 10
    x2 = jax.random.normal(kx2, (batch2, 8, 8), dtype=jnp.float32)
    out2 = jax.block_until_ready(mlp_forward(x2, params))
    ref2 = mlp_reference(x2, params)
    assert out2.shape == (batch2, N_OUT)
    assert jnp.allclose(out2, ref2, atol=1e-4, rtol=1e-4)

    print("KERNEL_OK")
</pallas_src>

<mosaic_0001>
module attributes {stable_mosaic.version = 11 : i64} {
  func.func @mlp_kernel(%arg0: i32, %arg1: memref<8x64xf32, #tpu.memory_space<vmem>>, %arg2: memref<64x64xf32, #tpu.memory_space<vmem>>, %arg3: memref<1x64xf32, #tpu.memory_space<vmem>>, %arg4: memref<64x256xf32, #tpu.memory_space<vmem>>, %arg5: memref<1x256xf32, #tpu.memory_space<vmem>>, %arg6: memref<256x128xf32, #tpu.memory_space<vmem>>, %arg7: memref<1x128xf32, #tpu.memory_space<vmem>>, %arg8: memref<8x128xf32, #tpu.memory_space<vmem>>) attributes {dimension_semantics = [#tpu.dimension_semantics<parallel>], iteration_bounds = array<i64: 3>, scalar_prefetch = 0 : i64, scratch_operands = 0 : i64, tpu.core_type = #tpu.core_type<tc>, window_params = [{transform_indices = @transform_0, window_bounds = array<i64: 8, 64>}, {pipeline_mode = #tpu.pipeline_mode<synchronous>, transform_indices = @transform_1, window_bounds = array<i64: 64, 64>}, {pipeline_mode = #tpu.pipeline_mode<synchronous>, transform_indices = @transform_2, window_bounds = array<i64: 1, 64>}, {pipeline_mode = #tpu.pipeline_mode<synchronous>, transform_indices = @transform_3, window_bounds = array<i64: 64, 256>}, {pipeline_mode = #tpu.pipeline_mode<synchronous>, transform_indices = @transform_4, window_bounds = array<i64: 1, 256>}, {pipeline_mode = #tpu.pipeline_mode<synchronous>, transform_indices = @transform_5, window_bounds = array<i64: 256, 128>}, {pipeline_mode = #tpu.pipeline_mode<synchronous>, transform_indices = @transform_6, window_bounds = array<i64: 1, 128>}, {transform_indices = @transform_7, window_bounds = array<i64: 8, 128>}]} {
    %c0 = arith.constant 0 : index
    %c0_0 = arith.constant 0 : index
    %0 = vector.load %arg1[%c0, %c0_0] : memref<8x64xf32, #tpu.memory_space<vmem>>, vector<8x64xf32>
    %c0_1 = arith.constant 0 : index
    %c0_2 = arith.constant 0 : index
    %1 = vector.load %arg2[%c0_1, %c0_2] : memref<64x64xf32, #tpu.memory_space<vmem>>, vector<64x64xf32>
    %cst = arith.constant dense<0.000000e+00> : vector<8x64xf32>
    %2 = tpu.matmul %0, %1, %cst {dimension_numbers = #tpu.dot_dimension_numbers<[1], [0], [0], [1], [0, 0, 1, 1], [], []>} : vector<8x64xf32>, vector<64x64xf32>, vector<8x64xf32> -> vector<8x64xf32>
    %c0_3 = arith.constant 0 : index
    %c0_4 = arith.constant 0 : index
    %3 = vector.load %arg3[%c0_3, %c0_4] : memref<1x64xf32, #tpu.memory_space<vmem>>, vector<1x64xf32>
    %4 = vector.broadcast %3 : vector<1x64xf32> to vector<8x64xf32>
    %5 = arith.addf %2, %4 : vector<8x64xf32>
    %cst_5 = arith.constant 0.000000e+00 : f32
    %6 = vector.broadcast %cst_5 : f32 to vector<8x64xf32>
    %7 = arith.maximumf %5, %6 : vector<8x64xf32>
    %c0_6 = arith.constant 0 : index
    %c0_7 = arith.constant 0 : index
    %8 = vector.load %arg4[%c0_6, %c0_7] : memref<64x256xf32, #tpu.memory_space<vmem>>, vector<64x256xf32>
    %cst_8 = arith.constant dense<0.000000e+00> : vector<8x256xf32>
    %9 = tpu.matmul %7, %8, %cst_8 {dimension_numbers = #tpu.dot_dimension_numbers<[1], [0], [0], [1], [0, 0, 1, 1], [], []>} : vector<8x64xf32>, vector<64x256xf32>, vector<8x256xf32> -> vector<8x256xf32>
    %c0_9 = arith.constant 0 : index
    %c0_10 = arith.constant 0 : index
    %10 = vector.load %arg5[%c0_9, %c0_10] : memref<1x256xf32, #tpu.memory_space<vmem>>, vector<1x256xf32>
    %11 = vector.broadcast %10 : vector<1x256xf32> to vector<8x256xf32>
    %12 = arith.addf %9, %11 : vector<8x256xf32>
    %cst_11 = arith.constant 0.000000e+00 : f32
    %13 = vector.broadcast %cst_11 : f32 to vector<8x256xf32>
    %14 = arith.maximumf %12, %13 : vector<8x256xf32>
    %c0_12 = arith.constant 0 : index
    %c0_13 = arith.constant 0 : index
    %15 = vector.load %arg6[%c0_12, %c0_13] : memref<256x128xf32, #tpu.memory_space<vmem>>, vector<256x128xf32>
    %cst_14 = arith.constant dense<0.000000e+00> : vector<8x128xf32>
    %16 = tpu.matmul %14, %15, %cst_14 {dimension_numbers = #tpu.dot_dimension_numbers<[1], [0], [0], [1], [0, 0, 1, 1], [], []>} : vector<8x256xf32>, vector<256x128xf32>, vector<8x128xf32> -> vector<8x128xf32>
    %c0_15 = arith.constant 0 : index
    %c0_16 = arith.constant 0 : index
    %17 = vector.load %arg7[%c0_15, %c0_16] : memref<1x128xf32, #tpu.memory_space<vmem>>, vector<1x128xf32>
    %18 = vector.broadcast %17 : vector<1x128xf32> to vector<8x128xf32>
    %19 = arith.addf %16, %18 : vector<8x128xf32>
    %c0_17 = arith.constant 0 : index
    %c0_18 = arith.constant 0 : index
    %20 = vector.load %arg8[%c0_17, %c0_18] : memref<8x128xf32, #tpu.memory_space<vmem>>, vector<8x128xf32>
    tpu.vector_store %arg8[%c0_17, %c0_18], %19 {strides = array<i32>} : memref<8x128xf32, #tpu.memory_space<vmem>>, vector<8x128xf32>,
    return
  }
  func.func @transform_0(%arg0: i32) -> (i32, i32) {
    %c0_i32 = arith.constant 0 : i32
    %c0_i32_0 = arith.constant 0 : i32
    return %arg0, %c0_i32 : i32, i32
  }
  func.func @transform_1(%arg0: i32) -> (i32, i32) {
    %c0_i32 = arith.constant 0 : i32
    %c0_i32_0 = arith.constant 0 : i32
    %c0_i32_1 = arith.constant 0 : i32
    return %c0_i32, %c0_i32_0 : i32, i32
  }
  func.func @transform_2(%arg0: i32) -> (i32, i32) {
    %c0_i32 = arith.constant 0 : i32
    %c0_i32_0 = arith.constant 0 : i32
    %c0_i32_1 = arith.constant 0 : i32
    return %c0_i32, %c0_i32_0 : i32, i32
  }
  func.func @transform_3(%arg0: i32) -> (i32, i32) {
    %c0_i32 = arith.constant 0 : i32
    %c0_i32_0 = arith.constant 0 : i32
    %c0_i32_1 = arith.constant 0 : i32
    return %c0_i32, %c0_i32_0 : i32, i32
  }
  func.func @transform_4(%arg0: i32) -> (i32, i32) {
    %c0_i32 = arith.constant 0 : i32
    %c0_i32_0 = arith.constant 0 : i32
    %c0_i32_1 = arith.constant 0 : i32
    return %c0_i32, %c0_i32_0 : i32, i32
  }
  func.func @transform_5(%arg0: i32) -> (i32, i32) {
    %c0_i32 = arith.constant 0 : i32
    %c0_i32_0 = arith.constant 0 : i32
    %c0_i32_1 = arith.constant 0 : i32
    return %c0_i32, %c0_i32_0 : i32, i32
  }
  func.func @transform_6(%arg0: i32) -> (i32, i32) {
    %c0_i32 = arith.constant 0 : i32
    %c0_i32_0 = arith.constant 0 : i32
    %c0_i32_1 = arith.constant 0 : i32
    return %c0_i32, %c0_i32_0 : i32, i32
  }
  func.func @transform_7(%arg0: i32) -> (i32, i32) {
    %c0_i32 = arith.constant 0 : i32
    %c0_i32_0 = arith.constant 0 : i32
    return %arg0, %c0_i32 : i32, i32
  }
}

</mosaic_0001>

<bundles_post_ra>
// kernel: _mlp_forward_impl.1
= control target key start
LH: loop header
LB: loop body
LE: loop exit
PB: predicated region body
PF: predicated region fallthrough
CT: control target
= control target key end

     0   :  { %s768_s24 = smov 0   ;;  %s971_s0 = inlined_call_operand.vmem [shape: f32[24,64], index: 0, kind: input, shape index: {}]   ;;  %s972_s1 = inlined_call_operand.vmem [shape: f32[64,64], index: 1, kind: input, shape index: {}]   ;;  %s973_s2 = inlined_call_operand.vmem [shape: f32[1,64], index: 2, kind: input, shape index: {}]   ;;  %s974_s3 = inlined_call_operand.vmem [shape: f32[64,256], index: 3, kind: input, shape index: {}]   ;;  %s975_s4 = inlined_call_operand.vmem [shape: f32[1,256], index: 4, kind: input, shape index: {}]   ;;  %s976_s5 = inlined_call_operand.vmem [shape: f32[256,128], index: 5, kind: input, shape index: {}]   ;;  %s977_s6 = inlined_call_operand.vmem [shape: f32[1,128], index: 6, kind: input, shape index: {}]   ;;  %s978_s7 = inlined_call_operand.vmem [shape: f32[24,128], index: 7, kind: output, shape index: {}]  }
   0x1 LB: > { %s632_s25 = sadd.s32 4294967295, %s724_s24   ;;  %p636_p0 = scmp.ge.s32.totalorder %s724_s24, 1  ;;  %s724_s24 = sphi %s768_s24, %s17_s24  }
   0x2   : > { %p236_p1 = scmp.lt.s32.totalorder %s724_s24, 4 }
   0x4   : > { %p237_p2 = pnand %p636_p0, %p236_p1 }
   0x5   : > { %p266_p3 = scmp.lt.s32.totalorder (!%p237_p2), %s632_s25, 2 }
   0x6   : > { %240 = sbr.rel (%p237_p2) target bundleno = 625 (0x271), region = 48 }
   0xb   : > { %v282_v0 = vld [vmem:[%s972_s1 + $0x38] sm:$0xff]  ;;  %v726_v1 = vmov 0.0   ;;  %v281_v2 = vld [vmem:[%s972_s1 + $0x30] sm:$0xff]  ;;  %vm727_vm0 = vmmov 0   ;;  %v280_v3 = vld [vmem:[%s972_s1 + $0x28] sm:$0xff]  ;;  %s980_s25 = smov (!%p266_p3, %s632_s25), 2  ;;  %v383_v63 = vlaneseq }
   0xc   : > { %689 = vmatprep.subr.mxu1 %v726_v1  ;;  %705 = vmatprep.mubr.msk.f32.mxu1 %vm727_vm0, %v726_v1  ;;  %v279_v4 = vld [vmem:[%s972_s1 + $0x20] sm:$0xff]  ;;  %v278_v5 = vld [vmem:[%s972_s1 + $0x18] sm:$0xff]  ;;  %s637_s13 = sshll.u32 %s980_s25, 3  ;;  %v277_v6 = vld [vmem:[%s972_s1 + $0x10] sm:$0xff]  ;;  %vm290_vm1 = vcmask 523264  }
   0xd   : > { %690 = vmatpush3.msra.mxu1 %v282_v0  ;;  %v276_v7 = vld [vmem:[%s972_s1 + $0x8] sm:$0xff]  ;;  %s269_s20 = scalar_lea.vmem %s971_s0, %s637_s13  ;;  %v275_v8 = vld [vmem:[%s972_s1] sm:$0xff]  ;;  %v380_v10 = vld [vmem:[%s974_s3 + $0x78] sm:$0xff]  ;;  %v384_v0 = vshrl.u32 %v383_v63, 7  ;;  %s273_s29 = scalar_lea.vmem %s978_s7, %s637_s13 }
   0xe   : > { %691 = vmatprep.subr.mxu1 %v726_v1  ;;  %v274_v9 = vld [vmem:[%s269_s20] sm:$0xff]  ;;  %v379_v11 = vld [vmem:[%s974_s3 + $0x70] sm:$0xff]  ;;  %v378_v12 = vld [vmem:[%s974_s3 + $0x68] sm:$0xff] }
   0xf   : > { %692 = vmatpush3.msra.mxu1 %v281_v2  ;;  %v377_v13 = vld [vmem:[%s974_s3 + $0x60] sm:$0xff]  ;;  %v376_v14 = vld [vmem:[%s974_s3 + $0x58] sm:$0xff]  ;;  %v375_v15 = vld [vmem:[%s974_s3 + $0x50] sm:$0xff] }
  0x10   : > { %693 = vmatprep.subr.mxu1 %v726_v1  ;;  %v374_v16 = vld [vmem:[%s974_s3 + $0x48] sm:$0xff]  ;;  %v373_v17 = vld [vmem:[%s974_s3 + $0x40] sm:$0xff]  ;;  %v372_v18 = vld [vmem:[%s974_s3 + $0x38] sm:$0xff] }
  0x11   : > { %694 = vmatpush3.msra.mxu1 %v280_v3  ;;  %v371_v19 = vld [vmem:[%s974_s3 + $0x30] sm:$0xff]  ;;  %v370_v20 = vld [vmem:[%s974_s3 + $0x28] sm:$0xff]  ;;  %v369_v21 = vld [vmem:[%s974_s3 + $0x20] sm:$0xff]  ;;  %v389_v3 = vsub.s32 1, %v384_v0 }
  0x12   : > { %695 = vmatprep.subr.mxu1 %v726_v1  ;;  %v368_v22 = vld [vmem:[%s974_s3 + $0x18] sm:$0xff]  ;;  %v367_v23 = vld [vmem:[%s974_s3 + $0x10] sm:$0xff]  ;;  %v366_v24 = vld [vmem:[%s974_s3 + $0x8] sm:$0xff] }
  0x13   : > { %696 = vmatpush3.msra.mxu1 %v279_v4  ;;  %v365_v25 = vld [vmem:[%s974_s3] sm:$0xff]  ;;  %v500_v26 = vld [vmem:[%s976_s5 + $0xf8] sm:$0xff]  ;;  %v499_v28 = vld [vmem:[%s976_s5 + $0xf0] sm:$0xff] }
  0x14   : > { %697 = vmatprep.subr.mxu1 %v726_v1  ;;  %v484_v27 = vld [vmem:[%s976_s5 + $0x78] sm:$0xff]  ;;  %654 = vmatprep.subr.mxu0 %v500_v26  ;;  %v483_v29 = vld [vmem:[%s976_s5 + $0x70] sm:$0xff]  ;;  %v498_v30 = vld [vmem:[%s976_s5 + $0xe8] sm:$0xff] }
  0x15   : > { %698 = vmatpush3.msra.mxu1 %v278_v5  ;;  %655 = vmatpush3.msra.mxu0 %v484_v27  ;;  %v482_v31 = vld [vmem:[%s976_s5 + $0x68] sm:$0xff]  ;;  %v497_v32 = vld [vmem:[%s976_s5 + $0xe0] sm:$0xff]  ;;  %v496_v34 = vld [vmem:[%s976_s5 + $0xd8] sm:$0xff] }
  0x16   : > { %699 = vmatprep.subr.mxu1 %v726_v1  ;;  %656 = vmatprep.subr.mxu0 %v499_v28  ;;  %v481_v33 = vld [vmem:[%s976_s5 + $0x60] sm:$0xff]  ;;  %v480_v35 = vld [vmem:[%s976_s5 + $0x58] sm:$0xff]  ;;  %v495_v36 = vld [vmem:[%s976_s5 + $0xd0] sm:$0xff] }
  0x17   : > { %700 = vmatpush3.msra.mxu1 %v277_v6  ;;  %657 = vmatpush3.msra.mxu0 %v483_v29  ;;  %v479_v37 = vld [vmem:[%s976_s5 + $0x50] sm:$0xff]  ;;  %v494_v38 = vld [vmem:[%s976_s5 + $0xc8] sm:$0xff]  ;;  %v493_v40 = vld [vmem:[%s976_s5 + $0xc0] sm:$0xff] }
  0x18   : > { %701 = vmatprep.subr.mxu1 %v726_v1  ;;  %658 = vmatprep.subr.mxu0 %v498_v30  ;;  %v478_v39 = vld [vmem:[%s976_s5 + $0x48] sm:$0xff]  ;;  %v477_v41 = vld [vmem:[%s976_s5 + $0x40] sm:$0xff]  ;;  %v492_v42 = vld [vmem:[%s976_s5 + $0xb8] sm:$0xff] }
  0x19   : > { %702 = vmatpush3.msra.mxu1 %v276_v7  ;;  %659 = vmatpush3.msra.mxu0 %v482_v31  ;;  %v476_v43 = vld [vmem:[%s976_s5 + $0x38] sm:$0xff]  ;;  %v491_v44 = vld [vmem:[%s976_s5 + $0xb0] sm:$0xff]  ;;  %v490_v46 = vld [vmem:[%s976_s5 + $0xa8] sm:$0xff] }
  0x1a   : > { %703 = vmatprep.subr.mxu1 %v726_v1  ;;  %660 = vmatprep.subr.mxu0 %v497_v32  ;;  %v475_v45 = vld [vmem:[%s976_s5 + $0x30] sm:$0xff]  ;;  %v474_v47 = vld [vmem:[%s976_s5 + $0x28] sm:$0xff]  ;;  %v489_v48 = vld [vmem:[%s976_s5 + $0xa0] sm:$0xff] }
  0x1b   : > { %704 = vmatpush3.msra.mxu1 %v275_v8  ;;  %661 = vmatpush3.msra.mxu0 %v481_v33  ;;  %v473_v49 = vld [vmem:[%s976_s5 + $0x20] sm:$0xff]  ;;  %v488_v55 = vld [vmem:[%s976_s5 + $0x98] sm:$0xff]  ;;  %v487_v57 = vld [vmem:[%s976_s5 + $0x90] sm:$0xff] }
  0x1c   : > { %706 = vmatmul.mubr.msk.f32.vlgmr.msra.gmra.mxu1 %vm290_vm1, %v274_v9  ;;  %412 = vmatprep.subr.mxu1 %v380_v10  ;;  %v639_v50 = vld [vmem:[%s973_s2] ss:$0 sm:$0xff]  ;;  %v472_v56 = vld [vmem:[%s976_s5 + $0x18] sm:$0xff]  ;;  %v471_v58 = vld [vmem:[%s976_s5 + $0x10] sm:$0xff] }
  0x1d   : > { %413 = vmatpush1.msra.mxu1 %v379_v11  ;;  %460 = vmatprep.mubr.f32.mxu1 %v726_v1  ;;  %v486_v59 = vld [vmem:[%s976_s5 + $0x88] sm:$0xff]  ;;  %v485_v61 = vld [vmem:[%s976_s5 + $0x80] sm:$0xff]  ;;  %v385_v1 = vsub.s32 0, %v384_v0 }
  0x1e   : > { %414 = vmatprep.subr.mxu1 %v378_v12  ;;  %662 = vmatprep.subr.mxu0 %v496_v34  ;;  %v470_v60 = vld [vmem:[%s976_s5 + $0x8] sm:$0xff]  ;;  %v469_v62 = vld [vmem:[%s976_s5] sm:$0xff] }
  0x1f   : > { %415 = vmatpush1.msra.mxu1 %v377_v13  ;;  %663 = vmatpush3.msra.mxu0 %v480_v35  ;;  %v381_v2 = vld [vmem:[%s975_s4] sm:$0x3] }
  0x20   : > { %416 = vmatprep.subr.mxu1 %v376_v14  ;;  %664 = vmatprep.subr.mxu0 %v495_v36  ;;  %v386_v4 = vrot.slane %v381_v2, %v385_v1  ;;  %v390_v5 = vrot.slane %v381_v2, %v389_v3  ;;  %v642_v13 = vld [vmem:[%s977_s6] ss:$0 sm:$0xff] }
  0x21   : > { %417 = vmatpush1.msra.mxu1 %v375_v15  ;;  %665 = vmatpush3.msra.mxu0 %v479_v37 }
  0x22   : > { %418 = vmatprep.subr.mxu1 %v374_v16  ;;  %666 = vmatprep.subr.mxu0 %v494_v38 }
  0x23   : > { %419 = vmatpush1.msra.mxu1 %v373_v17  ;;  %667 = vmatpush3.msra.mxu0 %v478_v39 }
  0x24   : > { %420 = vmatprep.subr.mxu1 %v372_v18  ;;  %668 = vmatprep.subr.mxu0 %v493_v40 }
  0x25   : > { %421 = vmatpush1.msra.mxu1 %v371_v19  ;;  %669 = vmatpush3.msra.mxu0 %v477_v41 }
  0x26   : > { %422 = vmatprep.subr.mxu1 %v370_v20  ;;  %670 = vmatprep.subr.mxu0 %v492_v42 }
  0x27   : > { %423 = vmatpush1.msra.mxu1 %v369_v21  ;;  %671 = vmatpush3.msra.mxu0 %v476_v43 }
  0x28   : > { %424 = vmatprep.subr.mxu1 %v368_v22  ;;  %672 = vmatprep.subr.mxu0 %v491_v44 }
  0x29   : > { %425 = vmatpush1.msra.mxu1 %v367_v23  ;;  %673 = vmatpush3.msra.mxu0 %v475_v45 }
  0x2a   : > { %426 = vmatprep.subr.mxu1 %v366_v24  ;;  %674 = vmatprep.subr.mxu0 %v490_v46 }
  0x2b   : > { %427 = vmatpush1.msra.mxu1 %v365_v25  ;;  %675 = vmatpush3.msra.mxu0 %v474_v47 }
  0x2c   : > { %676 = vmatprep.subr.mxu0 %v489_v48 }
  0x2d   : > { %677 = vmatpush3.msra.mxu0 %v473_v49 }
  0x2e   : > { %678 = vmatprep.subr.mxu0 %v488_v55 }
  0x2f   : > { %679 = vmatpush3.msra.mxu0 %v472_v56 }
  0x30   : > { %680 = vmatprep.subr.mxu0 %v487_v57 }
  0x31   : > { %681 = vmatpush3.msra.mxu0 %v471_v58 }
  0x32   : > { %682 = vmatprep.subr.mxu0 %v486_v59 }
  0x33   : > { %683 = vmatpush3.msra.mxu0 %v470_v60 }
  0x34   : > { %684 = vmatprep.subr.mxu0 %v485_v61 }
  0x35   : > { %685 = vmatpush3.msra.mxu0 %v469_v62 }
  0xdc   : > { %v360_v51 = vpop.f32.mrf.mxu1 }
  0xdd   : > { %v361_v52 = vadd.f32 %v639_v50, %v360_v51 }
  0xde   : > { %v707_v53 = vpop.f32.mrf.mxu1 }
  0xdf   : > { %v364_v54 = vmax.f32 %v361_v52, 0.0 }
  0xe1   : > { %641 = vmatmul.mubr.msk.f32.vlgmr.msra.gmra.mxu1 %vm290_vm1, %v364_v54 }
 0x1a1   : > { %v462_v6 = vpop.f32.mrf.mxu1 }
 0x1a2   : > { %v463_v7 = vadd.f32 %v462_v6, %v386_v4 }
 0x1a3   : > { %v464_v8 = vpop.f32.mrf.mxu1 }
 0x1a4   : > { %v465_v9 = vadd.f32 %v464_v8, %v390_v5  ;;  %v467_v11 = vmax.f32 %v463_v7, 0.0 }
 0x1a6   : > { %v468_v10 = vmax.f32 %v465_v9, 0.0 }
 0x1a8   : > { %572 = vmatprep.mubr.f32.mxu0 %v468_v10 }
 0x1a9   : > { %573 = vmatmul.mubr.f32.vlgmr.msra.gmra.mxu0 %v467_v11 }
 0x269   : > { %v686_v12 = vpop.f32.mrf.mxu0 }
 0x26b   : > { %v687_v14 = vpop.f32.mrf.mxu0 }
 0x26c   : > { %v688_v15 = vadd.f32 %v687_v14, %v686_v12 }
 0x26e   : > { %v575_v16 = vadd.f32 %v688_v15, %v642_v13 }
 0x270   : > { %578 = vst [vmem:[%s273_s29] sm:$0xff] %v575_v16 }
 0x271 PF: > { %s17_s24 = sadd.s32 1, %s724_s24  }
 0x272   : > { %p14_p4 = scmp.ge.s32.totalorder %s17_s24, 5  }
 0x274   :  { %16 = sbr.rel (!%p14_p4) target bundleno = 1 (0x1), region = 78 }

</bundles_post_ra>
